<compile_context>
chip_gen: v6e
topology: v6e:2x2x1
jax: 0.10.0
libtpu: 0.0.40
codegen_flags: <defaults>
</compile_context>

<pallas_src>
import jax
import jax.numpy as jnp
from jax.experimental import pallas as pl
from jax.experimental.pallas import tpu as pltpu


_HIDDEN_PAD = 128   # lane-dense hidden dim (H=64 -> 128, zero pad, exact)
_TILE_CAP = 2048    # max batch-tile rows


def _student_mlp_kernel(x_ref, w1_ref, b1_ref, w2_ref, b2_ref, o_ref):
    # First linear on the MXU: [TB, IN]bf16 @ [IN, Hp]bf16 -> f32
    h = jnp.dot(x_ref[...], w1_ref[...], preferred_element_type=jnp.float32)
    # Bias add + ReLU in f32 on the VPU (v5e has no bf16 VPU)
    h = jnp.maximum(h + b1_ref[...], 0.0)
    # Second linear: [TB, Hp]bf16 @ [Hp, C]bf16 -> f32
    out = jnp.dot(h.astype(w2_ref.dtype), w2_ref[...],
                  preferred_element_type=jnp.float32)
    o_ref[...] = (out + b2_ref[...]).astype(o_ref.dtype)


def prepare_student_params(w1, b1, w2, b2):
    """One-time parameter prep, hoisted out of the per-call path.

    w1: [IN, H], b1: [H], w2: [H, C], b2: [C]   (transposed vs torch weights)
    Hidden dim is zero-padded to 128 (lane-dense intermediate; exact since the
    padded w2 rows are zero) and the matmul operands are cast to bf16 for the
    MXU.  Biases stay f32.
    """
    IN, H = w1.shape
    C = w2.shape[1]
    hp = max(_HIDDEN_PAD, ((H + 127) // 128) * 128)
    w1p = jnp.pad(w1, ((0, 0), (0, hp - H))).astype(jnp.bfloat16)
    b1p = jnp.pad(b1, (0, hp - H)).reshape(1, hp).astype(jnp.float32)
    w2p = jnp.pad(w2, ((0, hp - H), (0, 0))).astype(jnp.bfloat16)
    b2p = b2.reshape(1, C).astype(jnp.float32)
    return w1p, b1p, w2p, b2p


def _default_tile_b(B):
    # Tile the batch only once each tile stays >= ~512 rows; below that the
    # ~0.35us fixed cost per grid step outweighs the DMA it would overlap.
    if B < 2048:
        return B
    # >= 4 steps and an even count (>= 2 pipelined steps per TensorCore with
    # v7x megacore), tiles capped near 2048 rows and 16-row aligned for the
    # bf16 (16,128) sublane tiling.
    n_steps = max(4, 2 * (-(-B // (2 * _TILE_CAP))))
    tile = -(-B // n_steps)
    tile = -(-tile // 16) * 16
    return min(tile, _TILE_CAP)


def student_forward(x, params, *, tile_b=None):
    """Fused Linear(IN->64) -> ReLU -> Linear(64->C) forward, one Pallas kernel.

    x: [B, IN] (f32 or bf16); params from prepare_student_params.
    Returns [B, C] float32 logits.
    """
    w1p, b1p, w2p, b2p = params
    B, IN = x.shape
    hp = w1p.shape[1]
    C = w2p.shape[1]

    if tile_b is None:
        tile_b = _default_tile_b(B)
    tile_b = min(tile_b, B)

    # bf16 activations halve the dominant (x) HBM read.  In a real pipeline the
    # producer should emit bf16 directly so this cast fuses upstream.
    if x.dtype != jnp.bfloat16:
        x = x.astype(jnp.bfloat16)

    grid = (pl.cdiv(B, tile_b),)

    # Advisory hint so XLA overlaps this small custom call with surrounding ops.
    cost = pl.CostEstimate(
        flops=2 * B * (IN * hp + hp * C),
        transcendentals=0,
        bytes_accessed=(2 * B * IN + 2 * IN * hp + 4 * hp
                        + 2 * hp * C + 4 * C + 4 * B * C),
    )

    # Explicit VMEM budget (layout-padded, double-buffered activation tiles),
    # so v5e's 16 MiB default scoped limit is never the silent constraint.
    def _pad_bytes(rows, cols, itemsize, sub):
        return (-(-rows // sub) * sub) * (-(-cols // 128) * 128) * itemsize

    vmem_need = (
        2 * _pad_bytes(tile_b, IN, 2, 16)          # x tiles (double-buffered)
        + 2 * _pad_bytes(tile_b, C, 4, 8)          # out tiles
        + 2 * (_pad_bytes(IN, hp, 2, 16) + _pad_bytes(1, hp, 4, 8)
               + _pad_bytes(hp, C, 2, 16) + _pad_bytes(1, C, 4, 8)))
    vmem_limit = min(max(vmem_need + (4 << 20), 16 << 20), 32 << 20)

    return pl.pallas_call(
        _student_mlp_kernel,
        out_shape=jax.ShapeDtypeStruct((B, C), jnp.float32),
        grid_spec=pl.GridSpec(
            grid=grid,
            in_specs=[
                # batch-tiled activations (pipelined / double-buffered)
                pl.BlockSpec((tile_b, IN), lambda i: (i, 0)),
                # parameters: grid-invariant whole-array blocks (Pallas skips
                # the re-fetch when the block index does not change)
                pl.BlockSpec((IN, hp), lambda i: (0, 0)),
                pl.BlockSpec((1, hp), lambda i: (0, 0)),
                pl.BlockSpec((hp, C), lambda i: (0, 0)),
                pl.BlockSpec((1, C), lambda i: (0, 0)),
            ],
            # Unpadded (B, C) output: last dim equals the full array dim so the
            # (8,128) rule is satisfied; 4*C bytes/row of writeback beats
            # padding C to 128 (12.8x more bytes) plus a post-kernel slice.
            out_specs=pl.BlockSpec((tile_b, C), lambda i: (i, 0)),
        ),
        compiler_params=pltpu.CompilerParams(
            dimension_semantics=("parallel",),
            vmem_limit_bytes=vmem_limit,
        ),
        cost_estimate=cost,
    )(x, w1p, b1p, w2p, b2p)


def _reference_forward(x, w1, b1, w2, b2):
    h = jnp.maximum(x @ w1 + b1, 0.0)
    return h @ w2 + b2


if __name__ == "__main__":
    # Small shapes consistent with the module: batch=8, inputs=32, classes=10
    B, IN, H, C = 8, 32, 64, 10

    key = jax.random.PRNGKey(0)
    kx, k1, k2, k3, k4 = jax.random.split(key, 5)

    x = jax.random.normal(kx, (B, IN), dtype=jnp.float32)
    # Deterministic parameter init (synthetic; mimics torch Linear scale).
    w1 = jax.random.uniform(k1, (IN, H), jnp.float32, -1.0, 1.0) / jnp.sqrt(IN)
    b1 = jax.random.uniform(k2, (H,), jnp.float32, -1.0, 1.0) / jnp.sqrt(IN)
    w2 = jax.random.uniform(k3, (H, C), jnp.float32, -1.0, 1.0) / jnp.sqrt(H)
    b2 = jax.random.uniform(k4, (C,), jnp.float32, -1.0, 1.0) / jnp.sqrt(H)

    # One-time param prep (pad hidden dim, cast to bf16) -- hoisted out of
    # the per-call path.
    params = prepare_student_params(w1, b1, w2, b2)

    out = jax.block_until_ready(student_forward(x, params))
    ref = _reference_forward(x, w1, b1, w2, b2)
    assert out.shape == (B, C)
    # bf16 matmul operands with f32 accumulate -> loose tolerance vs f32 ref.
    assert jnp.allclose(out, ref, atol=5e-2, rtol=5e-2), "mismatch vs reference"

    # Second check: multi-step grid with a partial last batch tile
    # (B2=72, tile_b=16 -> 5 grid steps, last tile of 8 rows).
    B2 = 72
    x2 = jax.random.normal(jax.random.PRNGKey(1), (B2, IN), dtype=jnp.float32)
    out2 = jax.block_until_ready(student_forward(x2, params, tile_b=16))
    ref2 = _reference_forward(x2, w1, b1, w2, b2)
    assert out2.shape == (B2, C)
    assert jnp.allclose(out2, ref2, atol=5e-2, rtol=5e-2), "mismatch (tiled)"

    print("KERNEL_OK")
</pallas_src>

<mosaic_0001>
module attributes {stable_mosaic.version = 11 : i64} {
  func.func @_student_mlp_kernel(%arg0: i32, %arg1: memref<8x32xbf16, #tpu.memory_space<vmem>>, %arg2: memref<32x128xbf16, #tpu.memory_space<vmem>>, %arg3: memref<1x128xf32, #tpu.memory_space<vmem>>, %arg4: memref<128x10xbf16, #tpu.memory_space<vmem>>, %arg5: memref<1x10xf32, #tpu.memory_space<vmem>>, %arg6: memref<8x10xf32, #tpu.memory_space<vmem>>) attributes {dimension_semantics = [#tpu.dimension_semantics<parallel>], iteration_bounds = array<i64: 1>, scalar_prefetch = 0 : i64, scratch_operands = 0 : i64, tpu.core_type = #tpu.core_type<tc>, window_params = [{transform_indices = @transform_0, window_bounds = array<i64: 8, 32>}, {pipeline_mode = #tpu.pipeline_mode<synchronous>, transform_indices = @transform_1, window_bounds = array<i64: 32, 128>}, {pipeline_mode = #tpu.pipeline_mode<synchronous>, transform_indices = @transform_2, window_bounds = array<i64: 1, 128>}, {pipeline_mode = #tpu.pipeline_mode<synchronous>, transform_indices = @transform_3, window_bounds = array<i64: 128, 10>}, {pipeline_mode = #tpu.pipeline_mode<synchronous>, transform_indices = @transform_4, window_bounds = array<i64: 1, 10>}, {transform_indices = @transform_5, window_bounds = array<i64: 8, 10>}]} {
    %c0 = arith.constant 0 : index
    %c0_0 = arith.constant 0 : index
    %0 = vector.load %arg1[%c0, %c0_0] : memref<8x32xbf16, #tpu.memory_space<vmem>>, vector<8x32xbf16>
    %c0_1 = arith.constant 0 : index
    %c0_2 = arith.constant 0 : index
    %1 = vector.load %arg2[%c0_1, %c0_2] : memref<32x128xbf16, #tpu.memory_space<vmem>>, vector<32x128xbf16>
    %cst = arith.constant dense<0.000000e+00> : vector<8x128xf32>
    %2 = tpu.matmul %0, %1, %cst {dimension_numbers = #tpu.dot_dimension_numbers<[1], [0], [0], [1], [0, 0, 1, 1], [], []>} : vector<8x32xbf16>, vector<32x128xbf16>, vector<8x128xf32> -> vector<8x128xf32>
    %c0_3 = arith.constant 0 : index
    %c0_4 = arith.constant 0 : index
    %3 = vector.load %arg3[%c0_3, %c0_4] : memref<1x128xf32, #tpu.memory_space<vmem>>, vector<1x128xf32>
    %4 = vector.broadcast %3 : vector<1x128xf32> to vector<8x128xf32>
    %5 = arith.addf %2, %4 : vector<8x128xf32>
    %cst_5 = arith.constant 0.000000e+00 : f32
    %6 = vector.broadcast %cst_5 : f32 to vector<8x128xf32>
    %7 = arith.maximumf %5, %6 : vector<8x128xf32>
    %8 = arith.truncf %7 : vector<8x128xf32> to vector<8x128xbf16>
    %c0_6 = arith.constant 0 : index
    %c0_7 = arith.constant 0 : index
    %9 = vector.load %arg4[%c0_6, %c0_7] : memref<128x10xbf16, #tpu.memory_space<vmem>>, vector<128x10xbf16>
    %cst_8 = arith.constant dense<0.000000e+00> : vector<8x10xf32>
    %10 = tpu.matmul %8, %9, %cst_8 {dimension_numbers = #tpu.dot_dimension_numbers<[1], [0], [0], [1], [0, 0, 1, 1], [], []>} : vector<8x128xbf16>, vector<128x10xbf16>, vector<8x10xf32> -> vector<8x10xf32>
    %c0_9 = arith.constant 0 : index
    %c0_10 = arith.constant 0 : index
    %11 = vector.load %arg5[%c0_9, %c0_10] : memref<1x10xf32, #tpu.memory_space<vmem>>, vector<1x10xf32>
    %12 = vector.broadcast %11 : vector<1x10xf32> to vector<8x10xf32>
    %13 = arith.addf %10, %12 : vector<8x10xf32>
    %c0_11 = arith.constant 0 : index
    %c0_12 = arith.constant 0 : index
    %14 = vector.load %arg6[%c0_11, %c0_12] : memref<8x10xf32, #tpu.memory_space<vmem>>, vector<8x10xf32>
    tpu.vector_store %arg6[%c0_11, %c0_12], %13 {strides = array<i32>} : memref<8x10xf32, #tpu.memory_space<vmem>>, vector<8x10xf32>,
    return
  }
  func.func @transform_0(%arg0: i32) -> (i32, i32) {
    %c0_i32 = arith.constant 0 : i32
    %c0_i32_0 = arith.constant 0 : i32
    return %arg0, %c0_i32 : i32, i32
  }
  func.func @transform_1(%arg0: i32) -> (i32, i32) {
    %c0_i32 = arith.constant 0 : i32
    %c0_i32_0 = arith.constant 0 : i32
    %c0_i32_1 = arith.constant 0 : i32
    return %c0_i32, %c0_i32_0 : i32, i32
  }
  func.func @transform_2(%arg0: i32) -> (i32, i32) {
    %c0_i32 = arith.constant 0 : i32
    %c0_i32_0 = arith.constant 0 : i32
    %c0_i32_1 = arith.constant 0 : i32
    return %c0_i32, %c0_i32_0 : i32, i32
  }
  func.func @transform_3(%arg0: i32) -> (i32, i32) {
    %c0_i32 = arith.constant 0 : i32
    %c0_i32_0 = arith.constant 0 : i32
    %c0_i32_1 = arith.constant 0 : i32
    return %c0_i32, %c0_i32_0 : i32, i32
  }
  func.func @transform_4(%arg0: i32) -> (i32, i32) {
    %c0_i32 = arith.constant 0 : i32
    %c0_i32_0 = arith.constant 0 : i32
    %c0_i32_1 = arith.constant 0 : i32
    return %c0_i32, %c0_i32_0 : i32, i32
  }
  func.func @transform_5(%arg0: i32) -> (i32, i32) {
    %c0_i32 = arith.constant 0 : i32
    %c0_i32_0 = arith.constant 0 : i32
    return %arg0, %c0_i32 : i32, i32
  }
}

</mosaic_0001>

<bundles_post_ra>
// kernel: tpu_custom_call.1
= control target key start
LH: loop header
LB: loop body
LE: loop exit
PB: predicated region body
PF: predicated region fallthrough
CT: control target
= control target key end

     0   :  { %v307_v1 = vmov 0.0   ;;  %vm308_vm0 = vmmov 0   ;;  %vm46_vm1 = vcmask 261120   ;;  %s382_s0 = inlined_call_operand.vmem [shape: bf16[8,32], index: 0, kind: input, shape index: {}]   ;;  %s383_s1 = inlined_call_operand.vmem [shape: bf16[32,128], index: 1, kind: input, shape index: {}]   ;;  %s384_s2 = inlined_call_operand.vmem [shape: f32[1,128], index: 2, kind: input, shape index: {}]   ;;  %s385_s3 = inlined_call_operand.vmem [shape: bf16[128,10], index: 3, kind: input, shape index: {}]   ;;  %s386_s4 = inlined_call_operand.vmem [shape: f32[1,10], index: 4, kind: input, shape index: {}]   ;;  %s387_s5 = inlined_call_operand.hbm [shape: f32[8,10], index: 5, kind: output, shape index: {}]  }
   0x1   :  { %v275_v0 = vld [vmem:[%s383_s1 + $0x8] sm:$0xff]   ;;  %244 = vmatprep.subr.bf16.mxu0 %v307_v1  ;;  %252 = vmatprep.subr.bf16.mxu1 %v307_v1  ;;  %v276_v2 = vld [vmem:[%s383_s1] sm:$0xff]   ;;  %v277_v3 = vld [vmem:[%s385_s3 + $0x38] sm:$0xff]  }
   0x2   :  { %245 = vmatpush3.bf16.msra.mxu0 %v275_v0  ;;  %248 = vmatprep.mubr.msk.bf16.mxu0 %vm308_vm0, %v307_v1  ;;  %v278_v4 = vld [vmem:[%s385_s3 + $0x30] sm:$0xff]   ;;  %v22_v5 = vld [vmem:[%s382_s0] sm:$0xf]  ;;  %v279_v6 = vld [vmem:[%s385_s3 + $0x28] sm:$0xff]  }
   0x3   :  { %246 = vmatprep.subr.bf16.mxu0 %v307_v1  ;;  %268 = vmatprep.mubr.msk.bf16.mxu1 %vm308_vm0, %v307_v1 }
   0x4   :  { %253 = vmatpush3.bf16.msra.mxu1 %v277_v3 }
   0x5   :  { %254 = vmatprep.subr.bf16.mxu1 %v307_v1 }
   0x6   :  { %247 = vmatpush3.bf16.msra.mxu0 %v276_v2 }
   0x8   :  { %255 = vmatpush3.bf16.msra.mxu1 %v278_v4 }
   0x9   :  { %249 = vmatmul.mubr.msk.bf16.vlgmr.msra.gmra.mxu0 %vm46_vm1, %v22_v5  ;;  %256 = vmatprep.subr.bf16.mxu1 %v307_v1 }
   0xa   :  { %10 = vsyncpa [#allocation3], 0  ;;  %v280_v7 = vld [vmem:[%s385_s3 + $0x20] sm:$0xff]   ;;  %v281_v8 = vld [vmem:[%s385_s3 + $0x18] sm:$0xff]   ;;  %s309_s17 = smov [#allocation2]   ;;  %vm203_vm2 = vcmask 80896  }
   0xb   :  { %v282_v9 = vld [vmem:[%s385_s3 + $0x10] sm:$0xff]   ;;  %v283_v10 = vld [vmem:[%s385_s3 + $0x8] sm:$0xff]   ;;  %v284_v11 = vld [vmem:[%s385_s3] sm:$0xff]   ;;  %s211_s18 = sshll.u32 %s309_s17, 4  ;;  %s212_s18 = int_to_ptr.vmem [resolvable:$true] %s211_s18 }
   0xc   :  { %257 = vmatpush3.bf16.msra.mxu1 %v279_v6  ;;  %v219_v12 = vld [vmem:[%s384_s2] ss:$0 sm:$0xff]  ;;  %s285_s2 = scalar_lea.vmem %s212_s18, 128  ;;  %p290_p1 = scmp.lt.s32.totalorder %s212_s18, %s212_s18 }
   0xd   :  { %258 = vmatprep.subr.bf16.mxu1 %v307_v1  ;;  %v223_v20 = vld [vmem:[%s386_s4] ss:$0 sm:$0xff]  ;;  %p286_p0 = scmp.ne.s32.totalorder %s212_s18, %s285_s2  ;;  %p291_p2 = scmp.lt.s32.totalorder %s285_s2, %s285_s2 }
   0xf   :  { %p292_p3 = por %p291_p2, %p290_p1 }
  0x10   :  { %259 = vmatpush3.bf16.msra.mxu1 %v280_v7 }
  0x11   :  { %260 = vmatprep.subr.bf16.mxu1 %v307_v1  ;;  %p293_p4 = pnand %p292_p3, %p286_p0 }
  0x14   :  { %261 = vmatpush3.bf16.msra.mxu1 %v281_v8 }
  0x15   :  { %262 = vmatprep.subr.bf16.mxu1 %v307_v1 }
  0x18   :  { %263 = vmatpush3.bf16.msra.mxu1 %v282_v9 }
  0x19   :  { %264 = vmatprep.subr.bf16.mxu1 %v307_v1 }
  0x1c   :  { %265 = vmatpush3.bf16.msra.mxu1 %v283_v10 }
  0x1d   :  { %266 = vmatprep.subr.bf16.mxu1 %v307_v1 }
  0x20   :  { %267 = vmatpush3.bf16.msra.mxu1 %v284_v11 }
  0xc9   :  { %v84_v13 = vpop.f32.mrf.mxu0 }
  0xca   :  { %v85_v14 = vadd.f32 %v219_v12, %v84_v13 }
  0xcb   :  { %v250_v15 = vpop.f32.mrf.mxu0 }
  0xcc   :  { %v90_v16 = vmax.f32 %v85_v14, 0.0 }
  0xcd   :  { %v87_v17 = vpop.f32.mrf.mxu0 }
  0xce   :  { %v91_v18 = vpack.c.bf16 %v90_v16, %v90_v16 }
  0xcf   :  { %v251_v19 = vpop.f32.mrf.mxu0 }
  0xd0   :  { %269 = vmatmul.mubr.bf16.vlgmr.msra.gmra.mxu1 %v91_v18 }
 0x190   :  { %v197_v21 = vpop.f32.mrf.mxu1 }
 0x191   :  { %v198_v22 = vadd.f32 %v223_v20, %v197_v21 }
 0x192   :  { %v270_v23 = vpop.f32.mrf.mxu1 }
 0x193   :  { %204 = vst.msk [vmem:[#allocation2] sm:$0xff] %vm203_vm2, %v198_v22 }
 0x194   :  { %v200_v24 = vpop.f32.mrf.mxu1 }
 0x195   :  { %296 = shalt.err (!%p293_p4)
}
 0x196   :  { %214 = dma.vmem_to_hbm [thread:$0]  %s212_s18, 128, %s387_s5, [#allocation3]   ;;  %v271_v25 = vpop.f32.mrf.mxu1 }
 0x197   :  { %305 = dma.done.wait [#allocation3], 128  }
 0x198   :  { %306 = vsyncadd [#allocation3], 4294967168 }
 0x199   :  { %218 = vsyncpa [#allocation3], 1 }

</bundles_post_ra>
